<compile_context>
chip_gen: v6e
topology: v6e:2x2x1
jax: 0.10.0
libtpu: 0.0.40
codegen_flags: <defaults>
</compile_context>

<pallas_src>
from functools import partial

import jax
import jax.numpy as jnp
from jax.experimental import pallas as pl
from jax.experimental.pallas import tpu as pltpu


def _single_param_kernel(p_ref, o_ref):
    # p_ref: SMEM ref of shape (1,)   (the parameter)
    # o_ref: SMEM ref of shape (1,)   (the scalar result, returned as out[0])
    o_ref[0] = p_ref[0]


def _call_kernel(param_1d: jax.Array) -> jax.Array:
    out = pl.pallas_call(
        _single_param_kernel,
        out_shape=jax.ShapeDtypeStruct((1,), param_1d.dtype),
        in_specs=[pl.BlockSpec(memory_space=pltpu.SMEM)],
        out_specs=pl.BlockSpec(memory_space=pltpu.SMEM),
        cost_estimate=pl.CostEstimate(flops=0, transcendentals=0, bytes_accessed=8),
    )(param_1d)
    # Single slice to produce the 0-d scalar, matching PyTorch's parameter[0].
    # Folded into the same executable by the jax.jit wrapper below.
    return out[0]


@jax.jit
def single_param_forward(param: jax.Array) -> jax.Array:
    """Equivalent of SingleParamFunction.forward(): returns param[0] as a 0-d scalar."""
    assert param.shape == (1,), "parameter must have shape (1,)"

    orig_dtype = param.dtype
    # SMEM is a 32-bit scalar path; route sub-32-bit dtypes through float32.
    if jnp.dtype(orig_dtype).itemsize < 4:
        y = _call_kernel(param.astype(jnp.float32))
        return y.astype(orig_dtype)
    return _call_kernel(param)


if __name__ == "__main__":
    # Exactly as the module's __init__: parameter = zeros(1), float32.
    param = jnp.zeros((1,), dtype=jnp.float32)

    y = single_param_forward(param)
    jax.block_until_ready(y)
    assert y.shape == ()
    assert float(y) == 0.0

    # Sanity check with a deterministic non-trivial parameter value.
    key = jax.random.PRNGKey(0)
    param2 = jax.random.normal(key, (1,), dtype=jnp.float32)
    y2 = single_param_forward(param2)
    jax.block_until_ready(y2)
    assert y2.shape == ()
    assert jnp.allclose(y2, param2[0])

    # Sub-32-bit dtype path (cast-through-f32 fallback for the SMEM route).
    param3 = param2.astype(jnp.bfloat16)
    y3 = single_param_forward(param3)
    jax.block_until_ready(y3)
    assert y3.shape == ()
    assert y3.dtype == jnp.bfloat16
    assert jnp.allclose(y3, param3[0])

    print("KERNEL_OK")
</pallas_src>

<mosaic_0001>
module attributes {stable_mosaic.version = 11 : i64} {
  func.func @_single_param_kernel(%arg0: memref<1xf32, #tpu.memory_space<smem>>, %arg1: memref<1xf32, #tpu.memory_space<smem>>) attributes {dimension_semantics = [], scalar_prefetch = 0 : i64, scratch_operands = 0 : i64, tpu.core_type = #tpu.core_type<tc>} {
    %c0 = arith.constant 0 : index
    %0 = memref.load %arg0[%c0] : memref<1xf32, #tpu.memory_space<smem>>
    %c0_0 = arith.constant 0 : index
    %1 = memref.load %arg1[%c0_0] : memref<1xf32, #tpu.memory_space<smem>>
    memref.store %0, %arg1[%c0_0] : memref<1xf32, #tpu.memory_space<smem>>
    return
  }
}

</mosaic_0001>

<bundles_post_ra>
// kernel: single_param_forward.1
= control target key start
LH: loop header
LB: loop body
LE: loop exit
PB: predicated region body
PF: predicated region fallthrough
CT: control target
= control target key end

     0   :  { %7 = vsyncpa [#allocation4], 0  ;;  %s37_s8 = smov [#allocation3]   ;;  %s54_s0 = inlined_call_operand.<no memory space> [shape: f32[1], index: 0, kind: input, shape index: {}]   ;;  %s55_s1 = inlined_call_operand.hbm [shape: f32[1], index: 1, kind: output, shape index: {}]  }
   0x1   :  { %12 = sst [smem:[#allocation3]] %s54_s0 }
   0x2   :  { %20 = dma.smem_to_hbm %s37_s8, 16, %s55_s1, [#allocation4]  }
   0x3   :  { %35 = dma.done.wait [#allocation4], 16  }
   0x4   :  { %36 = vsyncadd [#allocation4], 4294967280 }
   0x5   :  { %24 = sfence }
   0x6   :  { %25 = vsyncpa [#allocation4], 1 }

</bundles_post_ra>
